<compile_context>
chip_gen: v5e
topology: v5e:2x2
jax: 0.10.0
libtpu: 0.0.40
codegen_flags: <defaults>
</compile_context>

<pallas_src>
import functools

import jax
import jax.numpy as jnp
from jax import lax
from jax.experimental import pallas as pl
from jax.experimental.pallas import tpu as pltpu


def _value_net_kernel(x_ref, *refs, n_hidden, compute_dtype):
    """Transposed-layout MLP: activations are (features, batch_tile).

    x_ref    : (bt, state_dim)            f32   raw state tile (batch on sublanes)
    w_in_ref : (hidden, state_dim)        bf16
    w_hid_ref: (n_hidden, hidden, hidden) bf16  (only if n_hidden > 0)
    w_out_ref: (hidden, 1)                f32   value-head weight as a column
    b_ref    : (hidden, n_hidden + 2)     f32   column j = bias of layer j,
                                                value-head bias at [0, n_hidden+1]
    out_ref  : (1, bt)                    f32   batch on lanes (lane-dense store)
    """
    if n_hidden > 0:
        w_in_ref, w_hid_ref, w_out_ref, b_ref, out_ref = refs
    else:
        w_in_ref, w_out_ref, b_ref, out_ref = refs
        w_hid_ref = None

    # Cast in-kernel (no wrapper-side cast pass over HBM).
    x = x_ref[...].astype(compute_dtype)                       # (bt, state_dim)

    # Input layer: contract on state_dim of BOTH operands (== w_in @ x^T), so the
    # result lands as (hidden, bt) with batch on the lane axis. f32 accumulation.
    h = lax.dot_general(w_in_ref[...], x, (((1,), (1,)), ((), ())),
                        preferred_element_type=jnp.float32)
    # Fused bias + ReLU (f32, v5e-friendly) + downcast to the matmul dtype.
    h = jnp.maximum(h + b_ref[:, 0:1], 0.0).astype(compute_dtype)

    if n_hidden > 0:
        if n_hidden >= 8:
            # Deep config: keep only one weight slice hot; tight loop body.
            b_all = b_ref[...]
            lane_id = lax.broadcasted_iota(jnp.int32, b_ref.shape, 1)

            def body(i, h):
                b_col = jnp.sum(jnp.where(lane_id == i + 1, b_all, 0.0),
                                axis=1, keepdims=True)         # (hidden, 1)
                hf = jnp.dot(w_hid_ref[i], h,
                             preferred_element_type=jnp.float32)
                return jnp.maximum(hf + b_col, 0.0).astype(compute_dtype)

            h = lax.fori_loop(0, n_hidden, body, h)
        else:
            for i in range(n_hidden):
                hf = jnp.dot(w_hid_ref[i], h,
                             preferred_element_type=jnp.float32)
                h = jnp.maximum(hf + b_ref[:, i + 1:i + 2],
                                0.0).astype(compute_dtype)

    # Value head: 1-row matmul replaced by VPU multiply + sublane (XLU) reduce.
    v = jnp.sum(h.astype(jnp.float32) * w_out_ref[...], axis=0, keepdims=True)
    out_ref[...] = v + b_ref[0:1, n_hidden + 1:n_hidden + 2]    # (1, bt)


def _padded_vmem_bytes(arr):
    """Rough VMEM footprint of an array tile ((8,128) layout padding)."""
    shape = arr.shape
    lead = 1
    for d in shape[:-2]:
        lead *= int(d)
    sub = ((int(shape[-2]) + 7) // 8) * 8
    lane = ((int(shape[-1]) + 127) // 128) * 128
    return lead * sub * lane * arr.dtype.itemsize


def value_network_forward(state, params, *, batch_tile=16384,
                          compute_dtype=jnp.bfloat16):
    """state: (batch, state_dim) f32 (PyTorch layout, read directly — no
    transpose/cast/pad pass in the wrapper).

    params: PyTorch-layout list [(W, b), ...], W (out_features, in_features),
    b (out_features,); last pair is the value head. Returns (batch, 1) f32.
    """
    batch, state_dim = state.shape
    hidden = params[0][0].shape[0]
    n_total = len(params)              # n_layers feature Linears + value head
    n_hidden = n_total - 2             # hidden->hidden layers

    # --- pack parameters (constant index maps -> fetched once) ----------------
    w_in = params[0][0].astype(compute_dtype)                 # (hidden, state_dim)
    w_out = params[-1][0].T.astype(jnp.float32)               # (hidden, 1) column
    b_all = jnp.zeros((hidden, n_total), jnp.float32)
    for j in range(n_total - 1):
        b_all = b_all.at[:, j].set(params[j][1].astype(jnp.float32))
    b_all = b_all.at[0, n_total - 1].set(params[-1][1].astype(jnp.float32)[0])

    args = [state, w_in]
    if n_hidden > 0:
        w_hid = jnp.stack(
            [params[j][0] for j in range(1, n_total - 1)]).astype(compute_dtype)
        args.append(w_hid)
    args += [w_out, b_all]
    weight_bytes = sum(_padded_vmem_bytes(a) for a in args[1:])

    # --- VMEM-aware batch tile (batch sits on the lane axis) ------------------
    try:
        vmem_cap = int(pltpu.get_tpu_info().vmem_capacity_bytes)
    except Exception:
        vmem_cap = 64 * 2**20                                   # conservative (v7x)
    vmem_limit = min((vmem_cap * 3) // 4, 96 * 2**20)

    lane_pad_sd = ((state_dim + 127) // 128) * 128
    sub_pad_h = ((hidden + 7) // 8) * 8
    per_col = (2 * lane_pad_sd * 4        # x: double-buffered f32 input tile
               + 2 * 8 * 4                # out: double-buffered (1, bt) f32 tile
               + sub_pad_h * (4 + 2 + 4)) # live f32 h + bf16 h + reduce temp
    avail = max(vmem_limit - weight_bytes - (4 << 20), 2 << 20)

    bt = min(int(batch_tile), avail // per_col, ((batch + 127) // 128) * 128)
    if batch > 128:
        # Keep >= 2 grid steps so both v7x TensorCores get work.
        bt = min(bt, (((batch + 1) // 2) + 127) // 128 * 128)
    bt = max(128, (bt // 128) * 128)
    grid = ((batch + bt - 1) // bt,)

    flops = 2 * batch * (state_dim * hidden + n_hidden * hidden * hidden + hidden)
    bytes_accessed = int(state.size * 4
                         + sum(int(a.size) * a.dtype.itemsize for a in args[1:])
                         + batch * 4)
    cost = pl.CostEstimate(flops=int(flops), transcendentals=0,
                           bytes_accessed=bytes_accessed)

    kernel = functools.partial(_value_net_kernel, n_hidden=n_hidden,
                               compute_dtype=compute_dtype)

    def _call(single_buffer_params):
        pm = pl.Buffered(1) if single_buffer_params else None

        def const_spec(shape):
            idx = lambda i: (0,) * len(shape)
            if pm is None:
                return pl.BlockSpec(shape, idx)
            return pl.BlockSpec(shape, idx, pipeline_mode=pm)

        in_specs = [pl.BlockSpec((bt, state_dim), lambda i: (i, 0)),
                    const_spec((hidden, state_dim))]
        if n_hidden > 0:
            in_specs.append(const_spec((n_hidden, hidden, hidden)))
        in_specs += [const_spec((hidden, 1)), const_spec((hidden, n_total))]

        return pl.pallas_call(
            kernel,
            grid=grid,
            out_shape=jax.ShapeDtypeStruct((1, batch), jnp.float32),
            in_specs=in_specs,
            out_specs=pl.BlockSpec((1, bt), lambda i: (0, i)),   # lane-dense output
            compiler_params=pltpu.CompilerParams(
                dimension_semantics=("parallel",),
                vmem_limit_bytes=int(vmem_limit)),
            cost_estimate=cost,
        )(*args)

    try:
        out_t = _call(True)        # single-buffered resident weights
    except Exception:
        # Fallback if pl.Buffered(1) is rejected by this build: default
        # double-buffering only costs extra resident-weight VMEM.
        out_t = _call(False)

    return out_t.T                                              # (batch, 1)


def init_value_network_params(key, state_dim, hidden_dim, n_layers):
    """Synthetic init mirroring the PyTorch module's Linear shapes (out, in)."""
    dims = [state_dim] + [hidden_dim] * n_layers + [1]
    params = []
    for i in range(len(dims) - 1):
        key, kw, kb = jax.random.split(key, 3)
        fan_in, fan_out = dims[i], dims[i + 1]
        bound = 1.0 / jnp.sqrt(jnp.float32(fan_in))
        w = jax.random.uniform(kw, (fan_out, fan_in), jnp.float32, -bound, bound)
        b = jax.random.uniform(kb, (fan_out,), jnp.float32, -bound, bound)
        params.append((w, b))
    return params


def value_network_reference(state, params, compute_dtype=jnp.bfloat16):
    """Pure-JAX reference mirroring the kernel numerics (bf16 operands, f32 acc,
    f32 value-head products)."""
    h = state.astype(jnp.float32)
    for (w, b) in params[:-1]:
        hf = jnp.dot(h.astype(compute_dtype), w.T.astype(compute_dtype),
                     preferred_element_type=jnp.float32)
        h = jnp.maximum(hf + b.astype(jnp.float32), 0.0)
    w, b = params[-1]
    hq = h.astype(compute_dtype).astype(jnp.float32)
    v = jnp.sum(hq * w.astype(jnp.float32), axis=-1, keepdims=True)
    return v + b.astype(jnp.float32)


if __name__ == "__main__":
    state_dim, hidden_dim, n_layers = 16, 32, 3

    key = jax.random.PRNGKey(0)
    key, kp = jax.random.split(key)
    params = init_value_network_params(kp, state_dim, hidden_dim, n_layers)

    # Small primary case (single tile) plus a ragged multi-tile case.
    for batch in (8, 384):
        key, kx = jax.random.split(key)
        state = jax.random.normal(kx, (batch, state_dim), jnp.float32)

        value = jax.block_until_ready(value_network_forward(state, params))
        ref = value_network_reference(state, params)

        assert value.shape == (batch, 1), value.shape
        assert jnp.allclose(value, ref, atol=2e-3, rtol=2e-3), (
            float(jnp.max(jnp.abs(value - ref))))

    print("KERNEL_OK")
</pallas_src>

<mosaic_0001>
module attributes {stable_mosaic.version = 11 : i64} {
  func.func @_value_net_kernel(%arg0: i32, %arg1: memref<128x16xf32, #tpu.memory_space<vmem>>, %arg2: memref<32x16xbf16, #tpu.memory_space<vmem>>, %arg3: memref<2x32x32xbf16, #tpu.memory_space<vmem>>, %arg4: memref<32x1xf32, #tpu.memory_space<vmem>>, %arg5: memref<32x4xf32, #tpu.memory_space<vmem>>, %arg6: memref<1x128xf32, #tpu.memory_space<vmem>>) attributes {dimension_semantics = [#tpu.dimension_semantics<parallel>], iteration_bounds = array<i64: 1>, scalar_prefetch = 0 : i64, scratch_operands = 0 : i64, tpu.core_type = #tpu.core_type<tc>, window_params = [{transform_indices = @transform_0, window_bounds = array<i64: 128, 16>}, {pipeline_mode = #tpu.pipeline_mode<synchronous>, transform_indices = @transform_1, window_bounds = array<i64: 32, 16>}, {pipeline_mode = #tpu.pipeline_mode<synchronous>, transform_indices = @transform_2, window_bounds = array<i64: 2, 32, 32>}, {pipeline_mode = #tpu.pipeline_mode<synchronous>, transform_indices = @transform_3, window_bounds = array<i64: 32, 1>}, {pipeline_mode = #tpu.pipeline_mode<synchronous>, transform_indices = @transform_4, window_bounds = array<i64: 32, 4>}, {transform_indices = @transform_5, window_bounds = array<i64: 1, 128>}]} {
    %c0 = arith.constant 0 : index
    %c0_0 = arith.constant 0 : index
    %0 = vector.load %arg1[%c0, %c0_0] : memref<128x16xf32, #tpu.memory_space<vmem>>, vector<128x16xf32>
    %1 = arith.truncf %0 : vector<128x16xf32> to vector<128x16xbf16>
    %c0_1 = arith.constant 0 : index
    %c0_2 = arith.constant 0 : index
    %2 = vector.load %arg2[%c0_1, %c0_2] : memref<32x16xbf16, #tpu.memory_space<vmem>>, vector<32x16xbf16>
    %cst = arith.constant dense<0.000000e+00> : vector<32x128xf32>
    %3 = tpu.matmul %2, %1, %cst {dimension_numbers = #tpu.dot_dimension_numbers<[1], [1], [0], [0], [0, 0, 1, 0], [], []>} : vector<32x16xbf16>, vector<128x16xbf16>, vector<32x128xf32> -> vector<32x128xf32>
    %c0_3 = arith.constant 0 : index
    %c0_4 = arith.constant 0 : index
    %4 = vector.load %arg5[%c0_3, %c0_4] : memref<32x4xf32, #tpu.memory_space<vmem>>, vector<32x1xf32>
    %5 = vector.broadcast %4 : vector<32x1xf32> to vector<32x128xf32>
    %6 = arith.addf %3, %5 : vector<32x128xf32>
    %cst_5 = arith.constant 0.000000e+00 : f32
    %7 = vector.broadcast %cst_5 : f32 to vector<32x128xf32>
    %8 = arith.maximumf %6, %7 : vector<32x128xf32>
    %9 = arith.truncf %8 : vector<32x128xf32> to vector<32x128xbf16>
    %c0_6 = arith.constant 0 : index
    %c0_7 = arith.constant 0 : index
    %c0_8 = arith.constant 0 : index
    %10 = vector.load %arg3[%c0_6, %c0_7, %c0_8] : memref<2x32x32xbf16, #tpu.memory_space<vmem>>, vector<1x32x32xbf16>
    %11 = vector.shape_cast %10 : vector<1x32x32xbf16> to vector<32x32xbf16>
    %cst_9 = arith.constant dense<0.000000e+00> : vector<32x128xf32>
    %12 = tpu.matmul %11, %9, %cst_9 {dimension_numbers = #tpu.dot_dimension_numbers<[1], [0], [0], [1], [0, 0, 1, 1], [], []>} : vector<32x32xbf16>, vector<32x128xbf16>, vector<32x128xf32> -> vector<32x128xf32>
    %c0_10 = arith.constant 0 : index
    %c1 = arith.constant 1 : index
    %13 = vector.load %arg5[%c0_10, %c1] : memref<32x4xf32, #tpu.memory_space<vmem>>, vector<32x1xf32>
    %14 = vector.broadcast %13 : vector<32x1xf32> to vector<32x128xf32>
    %15 = arith.addf %12, %14 : vector<32x128xf32>
    %cst_11 = arith.constant 0.000000e+00 : f32
    %16 = vector.broadcast %cst_11 : f32 to vector<32x128xf32>
    %17 = arith.maximumf %15, %16 : vector<32x128xf32>
    %18 = arith.truncf %17 : vector<32x128xf32> to vector<32x128xbf16>
    %c1_12 = arith.constant 1 : index
    %c0_13 = arith.constant 0 : index
    %c0_14 = arith.constant 0 : index
    %19 = vector.load %arg3[%c1_12, %c0_13, %c0_14] : memref<2x32x32xbf16, #tpu.memory_space<vmem>>, vector<1x32x32xbf16>
    %20 = vector.shape_cast %19 : vector<1x32x32xbf16> to vector<32x32xbf16>
    %cst_15 = arith.constant dense<0.000000e+00> : vector<32x128xf32>
    %21 = tpu.matmul %20, %18, %cst_15 {dimension_numbers = #tpu.dot_dimension_numbers<[1], [0], [0], [1], [0, 0, 1, 1], [], []>} : vector<32x32xbf16>, vector<32x128xbf16>, vector<32x128xf32> -> vector<32x128xf32>
    %c0_16 = arith.constant 0 : index
    %c2 = arith.constant 2 : index
    %22 = vector.load %arg5[%c0_16, %c2] : memref<32x4xf32, #tpu.memory_space<vmem>>, vector<32x1xf32>
    %23 = vector.broadcast %22 : vector<32x1xf32> to vector<32x128xf32>
    %24 = arith.addf %21, %23 : vector<32x128xf32>
    %cst_17 = arith.constant 0.000000e+00 : f32
    %25 = vector.broadcast %cst_17 : f32 to vector<32x128xf32>
    %26 = arith.maximumf %24, %25 : vector<32x128xf32>
    %27 = arith.truncf %26 : vector<32x128xf32> to vector<32x128xbf16>
    %28 = arith.extf %27 : vector<32x128xbf16> to vector<32x128xf32>
    %c0_18 = arith.constant 0 : index
    %c0_19 = arith.constant 0 : index
    %29 = vector.load %arg4[%c0_18, %c0_19] : memref<32x1xf32, #tpu.memory_space<vmem>>, vector<32x1xf32>
    %30 = vector.broadcast %29 : vector<32x1xf32> to vector<32x128xf32>
    %31 = arith.mulf %28, %30 : vector<32x128xf32>
    %cst_20 = arith.constant dense<0.000000e+00> : vector<128xf32>
    %32 = vector.multi_reduction <add>, %31, %cst_20 [0] : vector<32x128xf32> to vector<128xf32>
    %33 = vector.shape_cast %32 : vector<128xf32> to vector<1x128xf32>
    %c0_21 = arith.constant 0 : index
    %c3 = arith.constant 3 : index
    %34 = vector.load %arg5[%c0_21, %c3] : memref<32x4xf32, #tpu.memory_space<vmem>>, vector<1x1xf32>
    %35 = vector.broadcast %34 : vector<1x1xf32> to vector<1x128xf32>
    %36 = arith.addf %33, %35 : vector<1x128xf32>
    %c0_22 = arith.constant 0 : index
    %c0_23 = arith.constant 0 : index
    %37 = vector.load %arg6[%c0_22, %c0_23] : memref<1x128xf32, #tpu.memory_space<vmem>>, vector<1x128xf32>
    tpu.vector_store %arg6[%c0_22, %c0_23], %36 {strides = array<i32>} : memref<1x128xf32, #tpu.memory_space<vmem>>, vector<1x128xf32>,
    return
  }
  func.func @transform_0(%arg0: i32) -> (i32, i32) {
    %c0_i32 = arith.constant 0 : i32
    %c0_i32_0 = arith.constant 0 : i32
    return %arg0, %c0_i32 : i32, i32
  }
  func.func @transform_1(%arg0: i32) -> (i32, i32) {
    %c0_i32 = arith.constant 0 : i32
    %c0_i32_0 = arith.constant 0 : i32
    %c0_i32_1 = arith.constant 0 : i32
    return %c0_i32, %c0_i32_0 : i32, i32
  }
  func.func @transform_2(%arg0: i32) -> (i32, i32, i32) {
    %c0_i32 = arith.constant 0 : i32
    %c0_i32_0 = arith.constant 0 : i32
    %c0_i32_1 = arith.constant 0 : i32
    %c0_i32_2 = arith.constant 0 : i32
    return %c0_i32, %c0_i32_0, %c0_i32_1 : i32, i32, i32
  }
  func.func @transform_3(%arg0: i32) -> (i32, i32) {
    %c0_i32 = arith.constant 0 : i32
    %c0_i32_0 = arith.constant 0 : i32
    %c0_i32_1 = arith.constant 0 : i32
    return %c0_i32, %c0_i32_0 : i32, i32
  }
  func.func @transform_4(%arg0: i32) -> (i32, i32) {
    %c0_i32 = arith.constant 0 : i32
    %c0_i32_0 = arith.constant 0 : i32
    %c0_i32_1 = arith.constant 0 : i32
    return %c0_i32, %c0_i32_0 : i32, i32
  }
  func.func @transform_5(%arg0: i32) -> (i32, i32) {
    %c0_i32 = arith.constant 0 : i32
    %c0_i32_0 = arith.constant 0 : i32
    return %c0_i32, %arg0 : i32, i32
  }
}

module attributes {stable_mosaic.version = 11 : i64} {
  func.func @_value_net_kernel(%arg0: i32, %arg1: memref<128x16xf32, #tpu.memory_space<vmem>>, %arg2: memref<32x16xbf16, #tpu.memory_space<vmem>>, %arg3: memref<2x32x32xbf16, #tpu.memory_space<vmem>>, %arg4: memref<32x1xf32, #tpu.memory_space<vmem>>, %arg5: memref<32x4xf32, #tpu.memory_space<vmem>>, %arg6: memref<1x128xf32, #tpu.memory_space<vmem>>) attributes {dimension_semantics = [#tpu.dimension_semantics<parallel>], iteration_bounds = array<i64: 1>, scalar_prefetch = 0 : i64, scratch_operands = 0 : i64, tpu.core_type = #tpu.core_type<tc>, window_params = [{transform_indices = @transform_0, window_bounds = array<i64: 128, 16>}, {pipeline_mode = #tpu.pipeline_mode<synchronous>, transform_indices = @transform_1, window_bounds = array<i64: 32, 16>}, {pipeline_mode = #tpu.pipeline_mode<synchronous>, transform_indices = @transform_2, window_bounds = array<i64: 2, 32, 32>}, {pipeline_mode = #tpu.pipeline_mode<synchronous>, transform_indices = @transform_3, window_bounds = array<i64: 32, 1>}, {pipeline_mode = #tpu.pipeline_mode<synchronous>, transform_indices = @transform_4, window_bounds = array<i64: 32, 4>}, {transform_indices = @transform_5, window_bounds = array<i64: 1, 128>}]} {
    %c0 = arith.constant 0 : index
    %c0_0 = arith.constant 0 : index
    %0 = vector.load %arg1[%c0, %c0_0] : memref<128x16xf32, #tpu.memory_space<vmem>>, vector<128x16xf32>
    %1 = arith.truncf %0 : vector<128x16xf32> to vector<128x16xbf16>
    %c0_1 = arith.constant 0 : index
    %c0_2 = arith.constant 0 : index
    %2 = vector.load %arg2[%c0_1, %c0_2] : memref<32x16xbf16, #tpu.memory_space<vmem>>, vector<32x16xbf16>
    %cst = arith.constant dense<0.000000e+00> : vector<32x128xf32>
    %3 = tpu.matmul %2, %1, %cst {dimension_numbers = #tpu.dot_dimension_numbers<[1], [1], [0], [0], [0, 0, 1, 0], [], []>} : vector<32x16xbf16>, vector<128x16xbf16>, vector<32x128xf32> -> vector<32x128xf32>
    %c0_3 = arith.constant 0 : index
    %c0_4 = arith.constant 0 : index
    %4 = vector.load %arg5[%c0_3, %c0_4] : memref<32x4xf32, #tpu.memory_space<vmem>>, vector<32x1xf32>
    %5 = vector.broadcast %4 : vector<32x1xf32> to vector<32x128xf32>
    %6 = arith.addf %3, %5 : vector<32x128xf32>
    %cst_5 = arith.constant 0.000000e+00 : f32
    %7 = vector.broadcast %cst_5 : f32 to vector<32x128xf32>
    %8 = arith.maximumf %6, %7 : vector<32x128xf32>
    %9 = arith.truncf %8 : vector<32x128xf32> to vector<32x128xbf16>
    %c0_6 = arith.constant 0 : index
    %c0_7 = arith.constant 0 : index
    %c0_8 = arith.constant 0 : index
    %10 = vector.load %arg3[%c0_6, %c0_7, %c0_8] : memref<2x32x32xbf16, #tpu.memory_space<vmem>>, vector<1x32x32xbf16>
    %11 = vector.shape_cast %10 : vector<1x32x32xbf16> to vector<32x32xbf16>
    %cst_9 = arith.constant dense<0.000000e+00> : vector<32x128xf32>
    %12 = tpu.matmul %11, %9, %cst_9 {dimension_numbers = #tpu.dot_dimension_numbers<[1], [0], [0], [1], [0, 0, 1, 1], [], []>} : vector<32x32xbf16>, vector<32x128xbf16>, vector<32x128xf32> -> vector<32x128xf32>
    %c0_10 = arith.constant 0 : index
    %c1 = arith.constant 1 : index
    %13 = vector.load %arg5[%c0_10, %c1] : memref<32x4xf32, #tpu.memory_space<vmem>>, vector<32x1xf32>
    %14 = vector.broadcast %13 : vector<32x1xf32> to vector<32x128xf32>
    %15 = arith.addf %12, %14 : vector<32x128xf32>
    %cst_11 = arith.constant 0.000000e+00 : f32
    %16 = vector.broadcast %cst_11 : f32 to vector<32x128xf32>
    %17 = arith.maximumf %15, %16 : vector<32x128xf32>
    %18 = arith.truncf %17 : vector<32x128xf32> to vector<32x128xbf16>
    %c1_12 = arith.constant 1 : index
    %c0_13 = arith.constant 0 : index
    %c0_14 = arith.constant 0 : index
    %19 = vector.load %arg3[%c1_12, %c0_13, %c0_14] : memref<2x32x32xbf16, #tpu.memory_space<vmem>>, vector<1x32x32xbf16>
    %20 = vector.shape_cast %19 : vector<1x32x32xbf16> to vector<32x32xbf16>
    %cst_15 = arith.constant dense<0.000000e+00> : vector<32x128xf32>
    %21 = tpu.matmul %20, %18, %cst_15 {dimension_numbers = #tpu.dot_dimension_numbers<[1], [0], [0], [1], [0, 0, 1, 1], [], []>} : vector<32x32xbf16>, vector<32x128xbf16>, vector<32x128xf32> -> vector<32x128xf32>
    %c0_16 = arith.constant 0 : index
    %c2 = arith.constant 2 : index
    %22 = vector.load %arg5[%c0_16, %c2] : memref<32x4xf32, #tpu.memory_space<vmem>>, vector<32x1xf32>
    %23 = vector.broadcast %22 : vector<32x1xf32> to vector<32x128xf32>
    %24 = arith.addf %21, %23 : vector<32x128xf32>
    %cst_17 = arith.constant 0.000000e+00 : f32
    %25 = vector.broadcast %cst_17 : f32 to vector<32x128xf32>
    %26 = arith.maximumf %24, %25 : vector<32x128xf32>
    %27 = arith.truncf %26 : vector<32x128xf32> to vector<32x128xbf16>
    %28 = arith.extf %27 : vector<32x128xbf16> to vector<32x128xf32>
    %c0_18 = arith.constant 0 : index
    %c0_19 = arith.constant 0 : index
    %29 = vector.load %arg4[%c0_18, %c0_19] : memref<32x1xf32, #tpu.memory_space<vmem>>, vector<32x1xf32>
    %30 = vector.broadcast %29 : vector<32x1xf32> to vector<32x128xf32>
    %31 = arith.mulf %28, %30 : vector<32x128xf32>
    %cst_20 = arith.constant dense<0.000000e+00> : vector<128xf32>
    %32 = vector.multi_reduction <add>, %31, %cst_20 [0] : vector<32x128xf32> to vector<128xf32>
    %33 = vector.shape_cast %32 : vector<128xf32> to vector<1x128xf32>
    %c0_21 = arith.constant 0 : index
    %c3 = arith.constant 3 : index
    %34 = vector.load %arg5[%c0_21, %c3] : memref<32x4xf32, #tpu.memory_space<vmem>>, vector<1x1xf32>
    %35 = vector.broadcast %34 : vector<1x1xf32> to vector<1x128xf32>
    %36 = arith.addf %33, %35 : vector<1x128xf32>
    %c0_22 = arith.constant 0 : index
    %c0_23 = arith.constant 0 : index
    %37 = vector.load %arg6[%c0_22, %c0_23] : memref<1x128xf32, #tpu.memory_space<vmem>>, vector<1x128xf32>
    tpu.vector_store %arg6[%c0_22, %c0_23], %36 {strides = array<i32>} : memref<1x128xf32, #tpu.memory_space<vmem>>, vector<1x128xf32>,
    return
  }
  func.func @transform_0(%arg0: i32) -> (i32, i32) {
    %c0_i32 = arith.constant 0 : i32
    %c0_i32_0 = arith.constant 0 : i32
    return %arg0, %c0_i32 : i32, i32
  }
  func.func @transform_1(%arg0: i32) -> (i32, i32) {
    %c0_i32 = arith.constant 0 : i32
    %c0_i32_0 = arith.constant 0 : i32
    %c0_i32_1 = arith.constant 0 : i32
    return %c0_i32, %c0_i32_0 : i32, i32
  }
  func.func @transform_2(%arg0: i32) -> (i32, i32, i32) {
    %c0_i32 = arith.constant 0 : i32
    %c0_i32_0 = arith.constant 0 : i32
    %c0_i32_1 = arith.constant 0 : i32
    %c0_i32_2 = arith.constant 0 : i32
    return %c0_i32, %c0_i32_0, %c0_i32_1 : i32, i32, i32
  }
  func.func @transform_3(%arg0: i32) -> (i32, i32) {
    %c0_i32 = arith.constant 0 : i32
    %c0_i32_0 = arith.constant 0 : i32
    %c0_i32_1 = arith.constant 0 : i32
    return %c0_i32, %c0_i32_0 : i32, i32
  }
  func.func @transform_4(%arg0: i32) -> (i32, i32) {
    %c0_i32 = arith.constant 0 : i32
    %c0_i32_0 = arith.constant 0 : i32
    %c0_i32_1 = arith.constant 0 : i32
    return %c0_i32, %c0_i32_0 : i32, i32
  }
  func.func @transform_5(%arg0: i32) -> (i32, i32) {
    %c0_i32 = arith.constant 0 : i32
    %c0_i32_0 = arith.constant 0 : i32
    return %c0_i32, %arg0 : i32, i32
  }
}

</mosaic_0001>

<bundles_post_ra>
// kernel: tpu_custom_call.1
= control target key start
LH: loop header
LB: loop body
LE: loop exit
PB: predicated region body
PF: predicated region fallthrough
CT: control target
= control target key end

     0   :  { %vm84_vm0 = vcmask 130048   ;;  %s580_s0 = inlined_call_operand.vmem [shape: f32[8,16], index: 0, kind: input, shape index: {}]   ;;  %s581_s1 = inlined_call_operand.vmem [shape: bf16[32,16], index: 1, kind: input, shape index: {}]   ;;  %s582_s2 = inlined_call_operand.vmem [shape: bf16[2,32,32], index: 2, kind: input, shape index: {}]   ;;  %s583_s3 = inlined_call_operand.vmem [shape: f32[32,1], index: 3, kind: input, shape index: {}]   ;;  %s584_s4 = inlined_call_operand.vmem [shape: f32[32,4], index: 4, kind: input, shape index: {}]   ;;  %s585_s5 = inlined_call_operand.hbm [shape: f32[1,8], index: 5, kind: output, shape index: {}]  }
   0x1   :  { %v36_v0 = vld [vmem:[%s580_s0 + $0x70] sm:$0xff]  ;;  %v37_v1 = vld [vmem:[%s580_s0 + $0x78] sm:$0xff]  ;;  %v34_v3 = vld [vmem:[%s580_s0 + $0x60] sm:$0xff] }
   0x2   :  { %v45_v2 = vpack.c.bf16 %v37_v1, %v36_v0  ;;  %v35_v4 = vld [vmem:[%s580_s0 + $0x68] sm:$0xff] }
   0x4   :  { %v113_v5 = vsel %vm84_vm0, %v45_v2, 0 }
   0x5   :  { %10 = vsyncpa [#allocation3], 0  ;;  %371 = vmatpush.bf16.xpose.msra.mxu3 %v113_v5  ;;  %115 = vmatpush.bf16.xpose.msra.mxu0 %v113_v5  ;;  %v44_v6 = vpack.c.bf16 %v35_v4, %v34_v3  ;;  %v32_v8 = vld [vmem:[%s580_s0 + $0x50] sm:$0xff]  ;;  %v33_v9 = vld [vmem:[%s580_s0 + $0x58] sm:$0xff]  ;;  %v421_v25 = vmov 0   ;;  %v422_v39 = vmov 1  }
   0x6   :  { %v43_v10 = vpack.c.bf16 %v33_v9, %v32_v8  ;;  %v30_v12 = vld [vmem:[%s580_s0 + $0x40] sm:$0xff]  ;;  %v31_v13 = vld [vmem:[%s580_s0 + $0x48] sm:$0xff]  ;;  %v28_v16 = vld [vmem:[%s580_s0 + $0x30] sm:$0xff]  ;;  %384 = vset.pattern.permute.xlu0 %v421_v25  ;;  %385 = vset.pattern.permute.xlu1 %v421_v25  ;;  %vm170_vm1 = vcmask 261120   ;;  %v423_v61 = vmov 2   ;;  %s322_s29 = sshll.u32 %s585_s5, 4  ;;  %s323_s29 = int_to_ptr.hbm [resolvable:$true] %s322_s29 }
   0x7   :  { %v110_v7 = vsel %vm84_vm0, %v44_v6, 0  ;;  %v42_v14 = vpack.c.bf16 %v31_v13, %v30_v12  ;;  %v29_v17 = vld [vmem:[%s580_s0 + $0x38] sm:$0xff]  ;;  %v26_v20 = vld [vmem:[%s580_s0 + $0x20] sm:$0xff]  ;;  %v27_v21 = vld [vmem:[%s580_s0 + $0x28] sm:$0xff]  ;;  %386 = vset.pattern.permute.xlu2 %v422_v39  ;;  %v424_v6 = vmov 3  }
   0x8   :  { %v107_v11 = vsel %vm84_vm0, %v43_v10, 0  ;;  %v41_v18 = vpack.c.bf16 %v29_v17, %v28_v16  ;;  %v500_v22 = vld [vmem:[%s584_s4 + $0x10] sm:$0xff]  ;;  %v505_v23 = vld [vmem:[%s584_s4] sm:$0xff]  ;;  %v40_v24 = vpack.c.bf16 %v27_v21, %v26_v20  ;;  %v25_v28 = vld [vmem:[%s580_s0 + $0x18] sm:$0xff] }
   0x9   :  { %v104_v15 = vsel %vm84_vm0, %v42_v14, 0  ;;  %66 = vperm.xlu0 %384, %v500_v22   ;;  %56 = vperm.xlu1 %385, %v505_v23   ;;  %v24_v27 = vld [vmem:[%s580_s0 + $0x10] sm:$0xff]  ;;  %v53_v29 = vld [vmem:[%s584_s4 + $0x18] sm:$0xff]  ;;  %v51_v30 = vld [vmem:[%s584_s4 + $0x8] sm:$0xff] }
   0xa   :  { %v101_v19 = vsel %vm84_vm0, %v41_v18, 0  ;;  %v98_v26 = vsel %vm84_vm0, %v40_v24, 0  ;;  %v39_v31 = vpack.c.bf16 %v25_v28, %v24_v27  ;;  %v22_v33 = vld [vmem:[%s580_s0] sm:$0xff]  ;;  %v23_v34 = vld [vmem:[%s580_s0 + $0x8] sm:$0xff]  ;;  %153 = vperm.xlu2 %386, %v500_v22   ;;  %v273_v18 = vld [vmem:[%s583_s3 + $0x18] sm:$0xff] }
   0xb   :  { %v38_v35 = vpack.c.bf16 %v23_v34, %v22_v33  ;;  %v366_v37 = vld [vmem:[%s581_s1 + $0x8] sm:$0xff]  ;;  %v365_v38 = vld [vmem:[%s581_s1] sm:$0xff]  ;;  %v369_v21 = vld [vmem:[%s582_s2 + $0x10] sm:$0xff] }
   0xc   :  { %v95_v32 = vsel %vm84_vm0, %v39_v31, 0  ;;  %v367_v58 = vld [vmem:[%s582_s2] sm:$0xff]  ;;  %v368_v59 = vld [vmem:[%s582_s2 + $0x8] sm:$0xff] }
   0xd   :  { %372 = vmatpush.bf16.xpose.msra.mxu3 %v110_v7  ;;  %116 = vmatpush.bf16.xpose.msra.mxu0 %v110_v7  ;;  %v92_v36 = vsel %vm84_vm0, %v38_v35, 0  ;;  %v270_v2 = vld [vmem:[%s583_s3] sm:$0xff]  ;;  %v271_v3 = vld [vmem:[%s583_s3 + $0x8] sm:$0xff] }
   0xe   :  { %v307_v7 = vld [vmem:[%s584_s4] sm:$0x1] }
  0x11   :  { %71 = vperm.xlu0 %384, %v53_v29   ;;  %61 = vperm.xlu1 %385, %v51_v30  }
  0x12   :  { %157 = vperm.xlu2 %386, %v53_v29  }
  0x15   :  { %373 = vmatpush.bf16.xpose.msra.mxu3 %v107_v11  ;;  %117 = vmatpush.bf16.xpose.msra.mxu0 %v107_v11 }
  0x19   :  { %387 = vset.pattern.permute.xlu0 %v422_v39  ;;  %388 = vset.pattern.permute.xlu1 %v422_v39 }
  0x1a   :  { %145 = vperm.xlu0 %387, %v505_v23   ;;  %149 = vperm.xlu1 %388, %v51_v30  }
  0x1b   :  { %389 = vset.pattern.permute.xlu2 %v423_v61 }
  0x1c   :  { %208 = vperm.xlu2 %389, %v505_v23  }
  0x1d   :  { %374 = vmatpush.bf16.xpose.msra.mxu3 %v104_v15  ;;  %118 = vmatpush.bf16.xpose.msra.mxu0 %v104_v15  ;;  %v272_v15 = vld [vmem:[%s583_s3 + $0x10] sm:$0xff] }
  0x22   :  { %390 = vset.pattern.permute.xlu1 %v423_v61  ;;  %391 = vset.pattern.permute.xlu0 %v423_v61 }
  0x23   :  { %212 = vperm.xlu1 %390, %v51_v30   ;;  %220 = vperm.xlu0 %391, %v53_v29  }
  0x24   :  { %216 = vperm.xlu2 %389, %v500_v22   ;;  %v370_v22 = vld [vmem:[%s582_s2 + $0x18] sm:$0xff]  ;;  %s425_s2 = smov [#allocation2]  }
  0x25   :  { %375 = vmatpush.bf16.xpose.msra.mxu3 %v101_v19  ;;  %119 = vmatpush.bf16.xpose.msra.mxu0 %v101_v19  ;;  %s320_s3 = sshll.u32 %s425_s2, 4  ;;  %s321_s3 = int_to_ptr.vmem [resolvable:$true] %s320_s3 }
  0x2b   :  { %392 = vset.pattern.permute.xlu1 %v421_v25  ;;  %394 = vset.pattern.permute.xlu0 %v424_v6 }
  0x2c   :  { %276 = vperm.xlu1 %392, %v270_v2   ;;  %393 = vset.pattern.permute.xlu2 %v421_v25 }
  0x2d   :  { %376 = vmatpush.bf16.xpose.msra.mxu3 %v98_v26  ;;  %120 = vmatpush.bf16.xpose.msra.mxu0 %v98_v26 }
  0x2e   :  { %310 = vperm.xlu0 %394, %v307_v7   ;;  %281 = vperm.xlu2 %393, %v271_v3  }
  0x34   :  { %286 = vperm.xlu1 %392, %v272_v15  }
  0x35   :  { %377 = vmatpush.bf16.xpose.msra.mxu3 %v95_v32  ;;  %121 = vmatpush.bf16.xpose.msra.mxu0 %v95_v32 }
  0x36   :  { %291 = vperm.xlu2 %393, %v273_v18  }
  0x3d   :  { %378 = vmatpush.bf16.xpose.msra.mxu3 %v92_v36  ;;  %122 = vmatpush.bf16.xpose.msra.mxu0 %v92_v36 }
  0x44   :  { %340 = vmatmul.msk.bf16.vlgmr.msra.gmra.mxu3 %vm84_vm0, %v366_v37  ;;  %339 = vmatmul.msk.bf16.vlgmr.msra.gmra.mxu0 %vm84_vm0, %v365_v38 }
  0x64   :  { %v154_v63 = vpop.permute.xlu2 %153 }
  0x6c   :  { %v158_v8 = vpop.permute.xlu2 %157 }
  0x76   :  { %v209_v24 = vpop.permute.xlu2 %208 }
  0x7b   :  { %v57_v40 = vpop.permute.xlu1 %56  ;;  %v67_v42 = vpop.permute.xlu0 %66 }
  0x7e   :  { %v217_v28 = vpop.permute.xlu2 %216 }
  0x83   :  { %v62_v44 = vpop.permute.xlu1 %61  ;;  %v72_v47 = vpop.permute.xlu0 %71 }
  0x88   :  { %v282_v39 = vpop.permute.xlu2 %281 }
  0x8c   :  { %v150_v1 = vpop.permute.xlu1 %149  ;;  %v146_v4 = vpop.permute.xlu0 %145 }
  0x95   :  { %v213_v26 = vpop.permute.xlu1 %212 }
  0x9e   :  { %v277_v36 = vpop.permute.xlu1 %276 }
  0xc1   :  { %v124_v41 = vpop.f32.mrf.mxu0 }
  0xc2   :  { %v125_v49 = vadd.f32 %v124_v41, %v57_v40  ;;  %v221_v40 = vpop.permute.xlu0 %220 }
  0xc4   :  { %v134_v54 = vmax.f32 %v125_v49, 0.0 }
  0xc7   :  { %v129_v43 = vpop.f32.mrf.mxu3 }
  0xc8   :  { %v130_v46 = vadd.f32 %v129_v43, %v67_v42 }
  0xc9   :  { %v126_v45 = vpop.f32.mrf.mxu0 }
  0xca   :  { %v127_v50 = vadd.f32 %v126_v45, %v62_v44  ;;  %v136_v52 = vmax.f32 %v130_v46, 0.0 }
  0xcc   :  { %v135_v55 = vmax.f32 %v127_v50, 0.0 }
  0xce   :  { %v138_v57 = vpack.c.bf16 %v135_v55, %v134_v54  ;;  %v292_v54 = vpop.permute.xlu2 %291 }
  0xcf   :  { %v131_v48 = vpop.f32.mrf.mxu3 }
  0xd0   :  { %v132_v51 = vadd.f32 %v131_v48, %v72_v47  ;;  %v287_v48 = vpop.permute.xlu1 %286 }
  0xd2   :  { %v137_v53 = vmax.f32 %v132_v51, 0.0 }
  0xd4   :  { %v139_v56 = vpack.c.bf16 %v137_v53, %v136_v52 }
  0xd6   :  { %183 = vmatpush.bf16.msra.mxu1 %v139_v56 }
  0xda   :  { %184 = vmatpush.bf16.msra.mxu1 %v138_v57 }
  0xdd   :  { %349 = vmatmul.msk.bf16.vlgmr.msra.gmra.mxu1 %vm170_vm1, %v367_v58 }
  0xed   :  { %350 = vmatmul.msk.bf16.gmra.mxu1 %vm170_vm1, %v368_v59 }
 0x15a   :  { %v186_v60 = vpop.f32.mrf.mxu1 }
 0x15b   :  { %v187_v12 = vadd.f32 %v186_v60, %v146_v4 }
 0x15d   :  { %v196_v19 = vmax.f32 %v187_v12, 0.0 }
 0x162   :  { %v188_v62 = vpop.f32.mrf.mxu1 }
 0x163   :  { %v189_v10 = vadd.f32 %v188_v62, %v150_v1 }
 0x165   :  { %v197_v16 = vmax.f32 %v189_v10, 0.0 }
 0x167   :  { %v200_v20 = vpack.c.bf16 %v197_v16, %v196_v19 }
 0x16a   :  { %v191_v0 = vpop.f32.mrf.mxu1 }
 0x16b   :  { %v192_v5 = vadd.f32 %v191_v0, %v154_v63  ;;  %v311_v63 = vpop.permute.xlu0 %310 }
 0x16d   :  { %v198_v13 = vmax.f32 %v192_v5, 0.0 }
 0x172   :  { %v193_v9 = vpop.f32.mrf.mxu1 }
 0x173   :  { %v194_v11 = vadd.f32 %v193_v9, %v158_v8 }
 0x175   :  { %v199_v14 = vmax.f32 %v194_v11, 0.0 }
 0x177   :  { %v201_v17 = vpack.c.bf16 %v199_v14, %v198_v13 }
 0x179   :  { %245 = vmatpush.bf16.msra.mxu2 %v201_v17 }
 0x17d   :  { %246 = vmatpush.bf16.msra.mxu2 %v200_v20 }
 0x180   :  { %363 = vmatmul.msk.bf16.vlgmr.msra.gmra.mxu2 %vm170_vm1, %v369_v21 }
 0x190   :  { %364 = vmatmul.msk.bf16.gmra.mxu2 %vm170_vm1, %v370_v22 }
 0x203   :  { %v248_v23 = vpop.f32.mrf.mxu2 }
 0x204   :  { %v249_v29 = vadd.f32 %v248_v23, %v209_v24 }
 0x206   :  { %v258_v32 = vmax.f32 %v249_v29, 0.0 }
 0x208   :  { %v262_v37 = vpack.c.bf16 %v258_v32, %v258_v32 }
 0x20a   :  { %v266_v43 = vunpack.c.l.bf16 %v262_v37 }
 0x20b   :  { %v250_v25 = vpop.f32.mrf.mxu2 }
 0x20c   :  { %v251_v27 = vadd.f32 %v250_v25, %v213_v26  ;;  %v294_v49 = vmul.f32 %v277_v36, %v266_v43 }
 0x20e   :  { %v259_v30 = vmax.f32 %v251_v27, 0.0 }
 0x210   :  { %v263_v34 = vpack.c.bf16 %v259_v30, %v259_v30 }
 0x212   :  { %v267_v41 = vunpack.c.l.bf16 %v263_v34 }
 0x213   :  { %v253_v31 = vpop.f32.mrf.mxu2 }
 0x214   :  { %v254_v33 = vadd.f32 %v253_v31, %v217_v28  ;;  %v295_v46 = vmul.f32 %v282_v39, %v267_v41 }
 0x216   :  { %v260_v35 = vmax.f32 %v254_v33, 0.0  ;;  %v298_v52 = vadd.f32 %v295_v46, %v294_v49 }
 0x218   :  { %v264_v38 = vpack.c.bf16 %v260_v35, %v260_v35 }
 0x21a   :  { %v268_v44 = vunpack.c.l.bf16 %v264_v38 }
 0x21b   :  { %v255_v42 = vpop.f32.mrf.mxu2 }
 0x21c   :  { %v256_v45 = vadd.f32 %v255_v42, %v221_v40  ;;  %v296_v50 = vmul.f32 %v287_v48, %v268_v44 }
 0x21e   :  { %v261_v47 = vmax.f32 %v256_v45, 0.0  ;;  %v299_v55 = vadd.f32 %v298_v52, %v296_v50 }
 0x220   :  { %v265_v51 = vpack.c.bf16 %v261_v47, %v261_v47 }
 0x222   :  { %v269_v53 = vunpack.c.l.bf16 %v265_v51 }
 0x224   :  { %v297_v56 = vmul.f32 %v292_v54, %v269_v53 }
 0x226   :  { %v300_v57 = vadd.f32 %v299_v55, %v297_v56 }
 0x228   :  { %v301_v58 = vrot.slane %v300_v57, 4 }
 0x22a   :  { %v302_v59 = vadd.f32 %v301_v58, %v300_v57 }
 0x22c   :  { %v303_v60 = vrot.slane %v302_v59, 2 }
 0x22e   :  { %v304_v61 = vadd.f32 %v303_v60, %v302_v59 }
 0x230   :  { %v305_v62 = vrot.slane %v304_v61, 1 }
 0x232   :  { %v306_v0 = vadd.f32 %v305_v62, %v304_v61 }
 0x234   :  { %v313_v1 = vadd.f32 %v311_v63, %v306_v0 }
 0x236   :  { %314 = vst [vmem:[#allocation2] sm:$0x1] %v313_v1 }
 0x237   :  { %325 = dma.vmem_to_hbm [thread:$0]  %s321_s3, 16, %s323_s29, [#allocation3]  }
 0x238   :  { %419 = dma.done.wait [#allocation3], 16  }
 0x239   :  { %420 = vsyncadd [#allocation3], 4294967280 }
 0x23a   :  { %330 = vsyncpa [#allocation3], 1 }

// kernel: tpu_custom_call.1
= control target key start
LH: loop header
LB: loop body
LE: loop exit
PB: predicated region body
PF: predicated region fallthrough
CT: control target
= control target key end

     0   :  { %vm84_vm0 = vcmask 130048   ;;  %s580_s0 = inlined_call_operand.vmem [shape: f32[8,16], index: 0, kind: input, shape index: {}]   ;;  %s581_s1 = inlined_call_operand.vmem [shape: bf16[32,16], index: 1, kind: input, shape index: {}]   ;;  %s582_s2 = inlined_call_operand.vmem [shape: bf16[2,32,32], index: 2, kind: input, shape index: {}]   ;;  %s583_s3 = inlined_call_operand.vmem [shape: f32[32,1], index: 3, kind: input, shape index: {}]   ;;  %s584_s4 = inlined_call_operand.vmem [shape: f32[32,4], index: 4, kind: input, shape index: {}]   ;;  %s585_s5 = inlined_call_operand.hbm [shape: f32[1,8], index: 5, kind: output, shape index: {}]  }
   0x1   :  { %v36_v0 = vld [vmem:[%s580_s0 + $0x70] sm:$0xff]  ;;  %v37_v1 = vld [vmem:[%s580_s0 + $0x78] sm:$0xff]  ;;  %v34_v3 = vld [vmem:[%s580_s0 + $0x60] sm:$0xff] }
   0x2   :  { %v45_v2 = vpack.c.bf16 %v37_v1, %v36_v0  ;;  %v35_v4 = vld [vmem:[%s580_s0 + $0x68] sm:$0xff] }
   0x4   :  { %v113_v5 = vsel %vm84_vm0, %v45_v2, 0 }
   0x5   :  { %10 = vsyncpa [#allocation3], 0  ;;  %371 = vmatpush.bf16.xpose.msra.mxu3 %v113_v5  ;;  %115 = vmatpush.bf16.xpose.msra.mxu0 %v113_v5  ;;  %v44_v6 = vpack.c.bf16 %v35_v4, %v34_v3  ;;  %v32_v8 = vld [vmem:[%s580_s0 + $0x50] sm:$0xff]  ;;  %v33_v9 = vld [vmem:[%s580_s0 + $0x58] sm:$0xff]  ;;  %v421_v25 = vmov 0   ;;  %v422_v39 = vmov 1  }
   0x6   :  { %v43_v10 = vpack.c.bf16 %v33_v9, %v32_v8  ;;  %v30_v12 = vld [vmem:[%s580_s0 + $0x40] sm:$0xff]  ;;  %v31_v13 = vld [vmem:[%s580_s0 + $0x48] sm:$0xff]  ;;  %v28_v16 = vld [vmem:[%s580_s0 + $0x30] sm:$0xff]  ;;  %384 = vset.pattern.permute.xlu0 %v421_v25  ;;  %385 = vset.pattern.permute.xlu1 %v421_v25  ;;  %vm170_vm1 = vcmask 261120   ;;  %v423_v61 = vmov 2   ;;  %s322_s29 = sshll.u32 %s585_s5, 4  ;;  %s323_s29 = int_to_ptr.hbm [resolvable:$true] %s322_s29 }
   0x7   :  { %v110_v7 = vsel %vm84_vm0, %v44_v6, 0  ;;  %v42_v14 = vpack.c.bf16 %v31_v13, %v30_v12  ;;  %v29_v17 = vld [vmem:[%s580_s0 + $0x38] sm:$0xff]  ;;  %v26_v20 = vld [vmem:[%s580_s0 + $0x20] sm:$0xff]  ;;  %v27_v21 = vld [vmem:[%s580_s0 + $0x28] sm:$0xff]  ;;  %386 = vset.pattern.permute.xlu2 %v422_v39  ;;  %v424_v6 = vmov 3  }
   0x8   :  { %v107_v11 = vsel %vm84_vm0, %v43_v10, 0  ;;  %v41_v18 = vpack.c.bf16 %v29_v17, %v28_v16  ;;  %v500_v22 = vld [vmem:[%s584_s4 + $0x10] sm:$0xff]  ;;  %v505_v23 = vld [vmem:[%s584_s4] sm:$0xff]  ;;  %v40_v24 = vpack.c.bf16 %v27_v21, %v26_v20  ;;  %v25_v28 = vld [vmem:[%s580_s0 + $0x18] sm:$0xff] }
   0x9   :  { %v104_v15 = vsel %vm84_vm0, %v42_v14, 0  ;;  %66 = vperm.xlu0 %384, %v500_v22   ;;  %56 = vperm.xlu1 %385, %v505_v23   ;;  %v24_v27 = vld [vmem:[%s580_s0 + $0x10] sm:$0xff]  ;;  %v53_v29 = vld [vmem:[%s584_s4 + $0x18] sm:$0xff]  ;;  %v51_v30 = vld [vmem:[%s584_s4 + $0x8] sm:$0xff] }
   0xa   :  { %v101_v19 = vsel %vm84_vm0, %v41_v18, 0  ;;  %v98_v26 = vsel %vm84_vm0, %v40_v24, 0  ;;  %v39_v31 = vpack.c.bf16 %v25_v28, %v24_v27  ;;  %v22_v33 = vld [vmem:[%s580_s0] sm:$0xff]  ;;  %v23_v34 = vld [vmem:[%s580_s0 + $0x8] sm:$0xff]  ;;  %153 = vperm.xlu2 %386, %v500_v22   ;;  %v273_v18 = vld [vmem:[%s583_s3 + $0x18] sm:$0xff] }
   0xb   :  { %v38_v35 = vpack.c.bf16 %v23_v34, %v22_v33  ;;  %v366_v37 = vld [vmem:[%s581_s1 + $0x8] sm:$0xff]  ;;  %v365_v38 = vld [vmem:[%s581_s1] sm:$0xff]  ;;  %v369_v21 = vld [vmem:[%s582_s2 + $0x10] sm:$0xff] }
   0xc   :  { %v95_v32 = vsel %vm84_vm0, %v39_v31, 0  ;;  %v367_v58 = vld [vmem:[%s582_s2] sm:$0xff]  ;;  %v368_v59 = vld [vmem:[%s582_s2 + $0x8] sm:$0xff] }
   0xd   :  { %372 = vmatpush.bf16.xpose.msra.mxu3 %v110_v7  ;;  %116 = vmatpush.bf16.xpose.msra.mxu0 %v110_v7  ;;  %v92_v36 = vsel %vm84_vm0, %v38_v35, 0  ;;  %v270_v2 = vld [vmem:[%s583_s3] sm:$0xff]  ;;  %v271_v3 = vld [vmem:[%s583_s3 + $0x8] sm:$0xff] }
   0xe   :  { %v307_v7 = vld [vmem:[%s584_s4] sm:$0x1] }
  0x11   :  { %71 = vperm.xlu0 %384, %v53_v29   ;;  %61 = vperm.xlu1 %385, %v51_v30  }
  0x12   :  { %157 = vperm.xlu2 %386, %v53_v29  }
  0x15   :  { %373 = vmatpush.bf16.xpose.msra.mxu3 %v107_v11  ;;  %117 = vmatpush.bf16.xpose.msra.mxu0 %v107_v11 }
  0x19   :  { %387 = vset.pattern.permute.xlu0 %v422_v39  ;;  %388 = vset.pattern.permute.xlu1 %v422_v39 }
  0x1a   :  { %145 = vperm.xlu0 %387, %v505_v23   ;;  %149 = vperm.xlu1 %388, %v51_v30  }
  0x1b   :  { %389 = vset.pattern.permute.xlu2 %v423_v61 }
  0x1c   :  { %208 = vperm.xlu2 %389, %v505_v23  }
  0x1d   :  { %374 = vmatpush.bf16.xpose.msra.mxu3 %v104_v15  ;;  %118 = vmatpush.bf16.xpose.msra.mxu0 %v104_v15  ;;  %v272_v15 = vld [vmem:[%s583_s3 + $0x10] sm:$0xff] }
  0x22   :  { %390 = vset.pattern.permute.xlu1 %v423_v61  ;;  %391 = vset.pattern.permute.xlu0 %v423_v61 }
  0x23   :  { %212 = vperm.xlu1 %390, %v51_v30   ;;  %220 = vperm.xlu0 %391, %v53_v29  }
  0x24   :  { %216 = vperm.xlu2 %389, %v500_v22   ;;  %v370_v22 = vld [vmem:[%s582_s2 + $0x18] sm:$0xff]  ;;  %s425_s2 = smov [#allocation2]  }
  0x25   :  { %375 = vmatpush.bf16.xpose.msra.mxu3 %v101_v19  ;;  %119 = vmatpush.bf16.xpose.msra.mxu0 %v101_v19  ;;  %s320_s3 = sshll.u32 %s425_s2, 4  ;;  %s321_s3 = int_to_ptr.vmem [resolvable:$true] %s320_s3 }
  0x2b   :  { %392 = vset.pattern.permute.xlu1 %v421_v25  ;;  %394 = vset.pattern.permute.xlu0 %v424_v6 }
  0x2c   :  { %276 = vperm.xlu1 %392, %v270_v2   ;;  %393 = vset.pattern.permute.xlu2 %v421_v25 }
  0x2d   :  { %376 = vmatpush.bf16.xpose.msra.mxu3 %v98_v26  ;;  %120 = vmatpush.bf16.xpose.msra.mxu0 %v98_v26 }
  0x2e   :  { %310 = vperm.xlu0 %394, %v307_v7   ;;  %281 = vperm.xlu2 %393, %v271_v3  }
  0x34   :  { %286 = vperm.xlu1 %392, %v272_v15  }
  0x35   :  { %377 = vmatpush.bf16.xpose.msra.mxu3 %v95_v32  ;;  %121 = vmatpush.bf16.xpose.msra.mxu0 %v95_v32 }
  0x36   :  { %291 = vperm.xlu2 %393, %v273_v18  }
  0x3d   :  { %378 = vmatpush.bf16.xpose.msra.mxu3 %v92_v36  ;;  %122 = vmatpush.bf16.xpose.msra.mxu0 %v92_v36 }
  0x44   :  { %340 = vmatmul.msk.bf16.vlgmr.msra.gmra.mxu3 %vm84_vm0, %v366_v37  ;;  %339 = vmatmul.msk.bf16.vlgmr.msra.gmra.mxu0 %vm84_vm0, %v365_v38 }
  0x64   :  { %v154_v63 = vpop.permute.xlu2 %153 }
  0x6c   :  { %v158_v8 = vpop.permute.xlu2 %157 }
  0x76   :  { %v209_v24 = vpop.permute.xlu2 %208 }
  0x7b   :  { %v57_v40 = vpop.permute.xlu1 %56  ;;  %v67_v42 = vpop.permute.xlu0 %66 }
  0x7e   :  { %v217_v28 = vpop.permute.xlu2 %216 }
  0x83   :  { %v62_v44 = vpop.permute.xlu1 %61  ;;  %v72_v47 = vpop.permute.xlu0 %71 }
  0x88   :  { %v282_v39 = vpop.permute.xlu2 %281 }
  0x8c   :  { %v150_v1 = vpop.permute.xlu1 %149  ;;  %v146_v4 = vpop.permute.xlu0 %145 }
  0x95   :  { %v213_v26 = vpop.permute.xlu1 %212 }
  0x9e   :  { %v277_v36 = vpop.permute.xlu1 %276 }
  0xc1   :  { %v124_v41 = vpop.f32.mrf.mxu0 }
  0xc2   :  { %v125_v49 = vadd.f32 %v124_v41, %v57_v40  ;;  %v221_v40 = vpop.permute.xlu0 %220 }
  0xc4   :  { %v134_v54 = vmax.f32 %v125_v49, 0.0 }
  0xc7   :  { %v129_v43 = vpop.f32.mrf.mxu3 }
  0xc8   :  { %v130_v46 = vadd.f32 %v129_v43, %v67_v42 }
  0xc9   :  { %v126_v45 = vpop.f32.mrf.mxu0 }
  0xca   :  { %v127_v50 = vadd.f32 %v126_v45, %v62_v44  ;;  %v136_v52 = vmax.f32 %v130_v46, 0.0 }
  0xcc   :  { %v135_v55 = vmax.f32 %v127_v50, 0.0 }
  0xce   :  { %v138_v57 = vpack.c.bf16 %v135_v55, %v134_v54  ;;  %v292_v54 = vpop.permute.xlu2 %291 }
  0xcf   :  { %v131_v48 = vpop.f32.mrf.mxu3 }
  0xd0   :  { %v132_v51 = vadd.f32 %v131_v48, %v72_v47  ;;  %v287_v48 = vpop.permute.xlu1 %286 }
  0xd2   :  { %v137_v53 = vmax.f32 %v132_v51, 0.0 }
  0xd4   :  { %v139_v56 = vpack.c.bf16 %v137_v53, %v136_v52 }
  0xd6   :  { %183 = vmatpush.bf16.msra.mxu1 %v139_v56 }
  0xda   :  { %184 = vmatpush.bf16.msra.mxu1 %v138_v57 }
  0xdd   :  { %349 = vmatmul.msk.bf16.vlgmr.msra.gmra.mxu1 %vm170_vm1, %v367_v58 }
  0xed   :  { %350 = vmatmul.msk.bf16.gmra.mxu1 %vm170_vm1, %v368_v59 }
 0x15a   :  { %v186_v60 = vpop.f32.mrf.mxu1 }
 0x15b   :  { %v187_v12 = vadd.f32 %v186_v60, %v146_v4 }
 0x15d   :  { %v196_v19 = vmax.f32 %v187_v12, 0.0 }
 0x162   :  { %v188_v62 = vpop.f32.mrf.mxu1 }
 0x163   :  { %v189_v10 = vadd.f32 %v188_v62, %v150_v1 }
 0x165   :  { %v197_v16 = vmax.f32 %v189_v10, 0.0 }
 0x167   :  { %v200_v20 = vpack.c.bf16 %v197_v16, %v196_v19 }
 0x16a   :  { %v191_v0 = vpop.f32.mrf.mxu1 }
 0x16b   :  { %v192_v5 = vadd.f32 %v191_v0, %v154_v63  ;;  %v311_v63 = vpop.permute.xlu0 %310 }
 0x16d   :  { %v198_v13 = vmax.f32 %v192_v5, 0.0 }
 0x172   :  { %v193_v9 = vpop.f32.mrf.mxu1 }
 0x173   :  { %v194_v11 = vadd.f32 %v193_v9, %v158_v8 }
 0x175   :  { %v199_v14 = vmax.f32 %v194_v11, 0.0 }
 0x177   :  { %v201_v17 = vpack.c.bf16 %v199_v14, %v198_v13 }
 0x179   :  { %245 = vmatpush.bf16.msra.mxu2 %v201_v17 }
 0x17d   :  { %246 = vmatpush.bf16.msra.mxu2 %v200_v20 }
 0x180   :  { %363 = vmatmul.msk.bf16.vlgmr.msra.gmra.mxu2 %vm170_vm1, %v369_v21 }
 0x190   :  { %364 = vmatmul.msk.bf16.gmra.mxu2 %vm170_vm1, %v370_v22 }
 0x203   :  { %v248_v23 = vpop.f32.mrf.mxu2 }
 0x204   :  { %v249_v29 = vadd.f32 %v248_v23, %v209_v24 }
 0x206   :  { %v258_v32 = vmax.f32 %v249_v29, 0.0 }
 0x208   :  { %v262_v37 = vpack.c.bf16 %v258_v32, %v258_v32 }
 0x20a   :  { %v266_v43 = vunpack.c.l.bf16 %v262_v37 }
 0x20b   :  { %v250_v25 = vpop.f32.mrf.mxu2 }
 0x20c   :  { %v251_v27 = vadd.f32 %v250_v25, %v213_v26  ;;  %v294_v49 = vmul.f32 %v277_v36, %v266_v43 }
 0x20e   :  { %v259_v30 = vmax.f32 %v251_v27, 0.0 }
 0x210   :  { %v263_v34 = vpack.c.bf16 %v259_v30, %v259_v30 }
 0x212   :  { %v267_v41 = vunpack.c.l.bf16 %v263_v34 }
 0x213   :  { %v253_v31 = vpop.f32.mrf.mxu2 }
 0x214   :  { %v254_v33 = vadd.f32 %v253_v31, %v217_v28  ;;  %v295_v46 = vmul.f32 %v282_v39, %v267_v41 }
 0x216   :  { %v260_v35 = vmax.f32 %v254_v33, 0.0  ;;  %v298_v52 = vadd.f32 %v295_v46, %v294_v49 }
 0x218   :  { %v264_v38 = vpack.c.bf16 %v260_v35, %v260_v35 }
 0x21a   :  { %v268_v44 = vunpack.c.l.bf16 %v264_v38 }
 0x21b   :  { %v255_v42 = vpop.f32.mrf.mxu2 }
 0x21c   :  { %v256_v45 = vadd.f32 %v255_v42, %v221_v40  ;;  %v296_v50 = vmul.f32 %v287_v48, %v268_v44 }
 0x21e   :  { %v261_v47 = vmax.f32 %v256_v45, 0.0  ;;  %v299_v55 = vadd.f32 %v298_v52, %v296_v50 }
 0x220   :  { %v265_v51 = vpack.c.bf16 %v261_v47, %v261_v47 }
 0x222   :  { %v269_v53 = vunpack.c.l.bf16 %v265_v51 }
 0x224   :  { %v297_v56 = vmul.f32 %v292_v54, %v269_v53 }
 0x226   :  { %v300_v57 = vadd.f32 %v299_v55, %v297_v56 }
 0x228   :  { %v301_v58 = vrot.slane %v300_v57, 4 }
 0x22a   :  { %v302_v59 = vadd.f32 %v301_v58, %v300_v57 }
 0x22c   :  { %v303_v60 = vrot.slane %v302_v59, 2 }
 0x22e   :  { %v304_v61 = vadd.f32 %v303_v60, %v302_v59 }
 0x230   :  { %v305_v62 = vrot.slane %v304_v61, 1 }
 0x232   :  { %v306_v0 = vadd.f32 %v305_v62, %v304_v61 }
 0x234   :  { %v313_v1 = vadd.f32 %v311_v63, %v306_v0 }
 0x236   :  { %314 = vst [vmem:[#allocation2] sm:$0x1] %v313_v1 }
 0x237   :  { %325 = dma.vmem_to_hbm [thread:$0]  %s321_s3, 16, %s323_s29, [#allocation3]  }
 0x238   :  { %419 = dma.done.wait [#allocation3], 16  }
 0x239   :  { %420 = vsyncadd [#allocation3], 4294967280 }
 0x23a   :  { %330 = vsyncpa [#allocation3], 1 }

</bundles_post_ra>
